<compile_context>
chip_gen: v5e
topology: v5e:2x2
jax: 0.10.0
libtpu: 0.0.40
codegen_flags: <defaults>
</compile_context>

<pallas_src>
import jax
import jax.numpy as jnp
from jax import lax
from jax.experimental import pallas as pl
from jax.experimental.pallas import tpu as pltpu


# ----------------------------------------------------------------------------
# Fused Pallas kernel: conv1 + BN1 + ReLU + conv2 + BN2 + residual + ReLU.
# One grid step processes one image in lane-packed (H, W*C) layout.
# ----------------------------------------------------------------------------
def _basic_block_kernel(x_ref, w1_ref, b1_ref, w2_ref, b2_ref, out_ref,
                        xp_ref, yp_ref):
    # x_ref  : (1, H, W*Cin)       bf16  lane-packed input image
    # w1_ref : (3, W*Cin, W*Cmid)  bf16  banded conv1 weights (BN1 scale folded)
    # b1_ref : (1, W*Cmid)         f32   BN1 bias tiled over W
    # w2_ref : (3, W*Cmid, W*Cout) bf16  banded conv2 weights (BN2 scale folded)
    # b2_ref : (1, W*Cout)         f32   BN2 bias tiled over W
    # out_ref: (1, H, W*Cout)      f32
    # xp_ref : (H+2, W*Cin)        f32   row-halo scratch for x
    # yp_ref : (H+2, W*Cmid)       f32   row-halo scratch for the intermediate
    H = out_ref.shape[1]
    wc_in = x_ref.shape[2]
    wc_mid = w1_ref.shape[2]
    wc_out = out_ref.shape[2]

    # ---- stage input with a 1-row zero halo (in-kernel padding, no HBM pad)
    xp_ref[0:1, :] = jnp.zeros((1, wc_in), jnp.float32)
    xp_ref[H + 1:H + 2, :] = jnp.zeros((1, wc_in), jnp.float32)
    xp_ref[1:H + 1, :] = x_ref[0].astype(jnp.float32)

    # ---- conv1 (BN1 scale folded into weights) + bias + ReLU ---------------
    acc1 = jnp.zeros((H, wc_mid), jnp.float32)
    for ky in range(3):
        acc1 = acc1 + jnp.dot(xp_ref[ky:ky + H, :].astype(jnp.bfloat16),
                              w1_ref[ky],
                              preferred_element_type=jnp.float32)
    y1 = jnp.maximum(acc1 + b1_ref[...], 0.0)

    # ---- intermediate activation stays in VMEM (no HBM round trip) ---------
    yp_ref[0:1, :] = jnp.zeros((1, wc_mid), jnp.float32)
    yp_ref[H + 1:H + 2, :] = jnp.zeros((1, wc_mid), jnp.float32)
    yp_ref[1:H + 1, :] = y1

    # ---- conv2 (BN2 scale folded) + bias + residual + ReLU -----------------
    acc2 = jnp.zeros((H, wc_out), jnp.float32)
    for ky in range(3):
        acc2 = acc2 + jnp.dot(yp_ref[ky:ky + H, :].astype(jnp.bfloat16),
                              w2_ref[ky],
                              preferred_element_type=jnp.float32)
    residual = x_ref[0].astype(jnp.float32)
    out_ref[0] = jnp.maximum(acc2 + b2_ref[...] + residual,
                             0.0).astype(out_ref.dtype)


def _fused_basic_block(x_lp, w1b, b1t, w2b, b2t):
    """x_lp: (N, H, W*Cin) bf16 -> (N, H, W*Cout) f32."""
    N, H, wc_in = x_lp.shape
    wc_mid = w1b.shape[2]
    wc_out = w2b.shape[2]
    return pl.pallas_call(
        _basic_block_kernel,
        out_shape=jax.ShapeDtypeStruct((N, H, wc_out), jnp.float32),
        grid=(N,),
        in_specs=[
            pl.BlockSpec((1, H, wc_in), lambda n: (n, 0, 0)),
            pl.BlockSpec((3, wc_in, wc_mid), lambda n: (0, 0, 0)),
            pl.BlockSpec((1, wc_mid), lambda n: (0, 0)),
            pl.BlockSpec((3, wc_mid, wc_out), lambda n: (0, 0, 0)),
            pl.BlockSpec((1, wc_out), lambda n: (0, 0)),
        ],
        out_specs=pl.BlockSpec((1, H, wc_out), lambda n: (n, 0, 0)),
        scratch_shapes=[
            pltpu.VMEM((H + 2, wc_in), jnp.float32),
            pltpu.VMEM((H + 2, wc_mid), jnp.float32),
        ],
        compiler_params=pltpu.CompilerParams(
            dimension_semantics=("parallel",),
            vmem_limit_bytes=32 * 1024 * 1024,
        ),
        # TODO(synk): for large images add a row-tiled 'parallel' grid axis
        # (with a 1-row halo) so both v7x TensorCores stay busy at small N.
    )(x_lp, w1b, b1t, w2b, b2t)


# ----------------------------------------------------------------------------
# Parameter setup (glue, plain JAX, runs once)
# ----------------------------------------------------------------------------
def _denseshift_quantize(w):
    # TODO(synk): exact DenseShiftConv2d8bit quantizer source not provided;
    # signed power-of-two rounding is used as a stand-in.
    exp = jnp.clip(jnp.round(jnp.log2(jnp.abs(w) + 1e-12)), -6.0, 6.0)
    return jnp.sign(w) * jnp.exp2(exp)


def _fold_bn(gamma, beta, mean, var, eps=1e-5):
    scale = gamma / jnp.sqrt(var + eps)
    bias = beta - mean * scale
    return scale, bias


def _make_banded(w_hwio, W):
    """(3,3,Cin,Cout) conv weights -> (3, W*Cin, W*Cout) banded matrices.

    banded[ky, win*Cin+ci, wout*Cout+co] = w[ky, win-wout+1, ci, co] when
    0 <= win-wout+1 < 3, else 0.  Folds kx taps, channel contraction and the
    zero padding along W into one matmul per kernel row.
    """
    kh, kw, cin, cout = w_hwio.shape
    win = jnp.arange(W)[:, None]
    wout = jnp.arange(W)[None, :]
    kx = win - wout + (kw // 2)
    valid = (kx >= 0) & (kx < kw)
    kx_c = jnp.clip(kx, 0, kw - 1)
    blocks = w_hwio[:, kx_c]                                # (kh, W, W, Cin, Cout)
    blocks = blocks * valid[None, :, :, None, None].astype(w_hwio.dtype)
    return jnp.transpose(blocks, (0, 1, 3, 2, 4)).reshape(kh, W * cin, W * cout)


def init_basic_block_params(key, inplanes, planes):
    assert inplanes == planes, "residual add requires inplanes == planes"
    # TODO(synk): downsample / stride>1 path of BasicBlock not implemented.
    ks = jax.random.split(key, 8)
    w1 = jax.random.normal(ks[0], (3, 3, inplanes, planes), jnp.float32)
    w1 = _denseshift_quantize(w1 * (2.0 / (9 * inplanes)) ** 0.5)
    w2 = jax.random.normal(ks[1], (3, 3, planes, planes), jnp.float32)
    w2 = _denseshift_quantize(w2 * (2.0 / (9 * planes)) ** 0.5)

    g1 = 1.0 + 0.1 * jax.random.normal(ks[2], (planes,), jnp.float32)
    b1 = 0.1 * jax.random.normal(ks[3], (planes,), jnp.float32)
    m1 = 0.1 * jax.random.normal(ks[4], (planes,), jnp.float32)
    v1 = jnp.abs(1.0 + 0.1 * jax.random.normal(ks[5], (planes,), jnp.float32))
    g2 = 1.0 + 0.1 * jax.random.normal(ks[6], (planes,), jnp.float32)
    b2 = 0.1 * jax.random.normal(ks[7], (planes,), jnp.float32)
    m2 = jnp.zeros((planes,), jnp.float32)
    v2 = jnp.ones((planes,), jnp.float32)

    # TODO(synk): training-mode batch statistics are not computed in-kernel.
    s1, o1 = _fold_bn(g1, b1, m1, v1)
    s2, o2 = _fold_bn(g2, b2, m2, v2)
    # Fold BN scale into the conv weights; bf16 for the MXU (powers of two are
    # exact in bf16; the scale-folded product is rounded once here and the
    # same values are used by both kernel and reference).
    w1f = (w1 * s1[None, None, None, :]).astype(jnp.bfloat16)
    w2f = (w2 * s2[None, None, None, :]).astype(jnp.bfloat16)
    return dict(w1f=w1f, o1=o1, w2f=w2f, o2=o2)


def prepare_block_params(params, W):
    """Build kernel-ready banded weights and W-tiled biases (done once)."""
    return dict(
        w1b=_make_banded(params["w1f"], W),
        b1t=jnp.tile(params["o1"], W)[None, :].astype(jnp.float32),
        w2b=_make_banded(params["w2f"], W),
        b2t=jnp.tile(params["o2"], W)[None, :].astype(jnp.float32),
    )


# ----------------------------------------------------------------------------
# Forward wrappers
# ----------------------------------------------------------------------------
def basic_block_forward_nhwc(x_nhwc, prep):
    """Preferred entry point (channels-last end-to-end, no transposes)."""
    N, H, W, C = x_nhwc.shape
    x_lp = x_nhwc.astype(jnp.bfloat16).reshape(N, H, W * C)   # lane-packed
    out_lp = _fused_basic_block(x_lp, prep["w1b"], prep["b1t"],
                                prep["w2b"], prep["b2t"])
    return out_lp.reshape(N, H, W, C)


def basic_block_forward(x_nchw, prep):
    """NCHW interface matching the PyTorch module (transposes at boundary)."""
    x = jnp.transpose(x_nchw, (0, 2, 3, 1))
    y = basic_block_forward_nhwc(x, prep)
    return jnp.transpose(y, (0, 3, 1, 2))


# ----------------------------------------------------------------------------
# Pure-JAX reference (correctness check; mirrors the bf16 casts)
# ----------------------------------------------------------------------------
def _ref_block(x_nchw, p):
    dn = ("NHWC", "HWIO", "NHWC")
    x = jnp.transpose(x_nchw, (0, 2, 3, 1)).astype(jnp.bfloat16)
    y = lax.conv_general_dilated(x, p["w1f"], (1, 1), "SAME",
                                 dimension_numbers=dn,
                                 preferred_element_type=jnp.float32)
    y = jnp.maximum(y + p["o1"], 0.0).astype(jnp.bfloat16)
    y = lax.conv_general_dilated(y, p["w2f"], (1, 1), "SAME",
                                 dimension_numbers=dn,
                                 preferred_element_type=jnp.float32)
    y = jnp.maximum(y + p["o2"] + x.astype(jnp.float32), 0.0)
    return jnp.transpose(y, (0, 3, 1, 2))


if __name__ == "__main__":
    N, C, H, W = 2, 8, 16, 16          # inplanes = planes = 8, stride = 1
    key = jax.random.PRNGKey(0)
    kx, kp = jax.random.split(key)
    x = jax.random.normal(kx, (N, C, H, W), jnp.float32)

    params = init_basic_block_params(kp, C, C)
    prep = prepare_block_params(params, W)

    out = jax.block_until_ready(basic_block_forward(x, prep))
    ref = jax.block_until_ready(_ref_block(x, params))

    assert out.shape == (N, C, H, W), out.shape
    max_err = float(jnp.max(jnp.abs(out - ref)))
    assert jnp.allclose(out, ref, atol=2e-2, rtol=2e-2), max_err
    print("KERNEL_OK")
</pallas_src>

<mosaic_0001>
module attributes {stable_mosaic.version = 11 : i64} {
  func.func @_basic_block_kernel(%arg0: i32, %arg1: memref<1x16x128xbf16, #tpu.memory_space<vmem>>, %arg2: memref<3x128x128xbf16, #tpu.memory_space<vmem>>, %arg3: memref<1x128xf32, #tpu.memory_space<vmem>>, %arg4: memref<3x128x128xbf16, #tpu.memory_space<vmem>>, %arg5: memref<1x128xf32, #tpu.memory_space<vmem>>, %arg6: memref<1x16x128xf32, #tpu.memory_space<vmem>>, %arg7: memref<18x128xf32, #tpu.memory_space<vmem>>, %arg8: memref<18x128xf32, #tpu.memory_space<vmem>>) attributes {dimension_semantics = [#tpu.dimension_semantics<parallel>], iteration_bounds = array<i64: 2>, scalar_prefetch = 0 : i64, scratch_operands = 2 : i64, tpu.core_type = #tpu.core_type<tc>, window_params = [{transform_indices = @transform_0, window_bounds = array<i64: 1, 16, 128>}, {pipeline_mode = #tpu.pipeline_mode<synchronous>, transform_indices = @transform_1, window_bounds = array<i64: 3, 128, 128>}, {pipeline_mode = #tpu.pipeline_mode<synchronous>, transform_indices = @transform_2, window_bounds = array<i64: 1, 128>}, {pipeline_mode = #tpu.pipeline_mode<synchronous>, transform_indices = @transform_3, window_bounds = array<i64: 3, 128, 128>}, {pipeline_mode = #tpu.pipeline_mode<synchronous>, transform_indices = @transform_4, window_bounds = array<i64: 1, 128>}, {transform_indices = @transform_5, window_bounds = array<i64: 1, 16, 128>}]} {
    %cst = arith.constant 0.000000e+00 : f32
    %0 = vector.broadcast %cst : f32 to vector<1x128xf32>
    %c0 = arith.constant 0 : index
    %c0_0 = arith.constant 0 : index
    %1 = vector.load %arg7[%c0, %c0_0] : memref<18x128xf32, #tpu.memory_space<vmem>>, vector<1x128xf32>
    tpu.vector_store %arg7[%c0, %c0_0], %0 {strides = array<i32>} : memref<18x128xf32, #tpu.memory_space<vmem>>, vector<1x128xf32>,
    %cst_1 = arith.constant 0.000000e+00 : f32
    %2 = vector.broadcast %cst_1 : f32 to vector<1x128xf32>
    %c17 = arith.constant 17 : index
    %c0_2 = arith.constant 0 : index
    %3 = vector.load %arg7[%c17, %c0_2] : memref<18x128xf32, #tpu.memory_space<vmem>>, vector<1x128xf32>
    tpu.vector_store %arg7[%c17, %c0_2], %2 {strides = array<i32>} : memref<18x128xf32, #tpu.memory_space<vmem>>, vector<1x128xf32>,
    %c0_3 = arith.constant 0 : index
    %c0_4 = arith.constant 0 : index
    %c0_5 = arith.constant 0 : index
    %4 = vector.load %arg1[%c0_3, %c0_4, %c0_5] : memref<1x16x128xbf16, #tpu.memory_space<vmem>>, vector<1x16x128xbf16>
    %5 = vector.shape_cast %4 : vector<1x16x128xbf16> to vector<16x128xbf16>
    %6 = arith.extf %5 : vector<16x128xbf16> to vector<16x128xf32>
    %c1 = arith.constant 1 : index
    %c0_6 = arith.constant 0 : index
    %7 = vector.load %arg7[%c1, %c0_6] : memref<18x128xf32, #tpu.memory_space<vmem>>, vector<16x128xf32>
    tpu.vector_store %arg7[%c1, %c0_6], %6 {strides = array<i32>} : memref<18x128xf32, #tpu.memory_space<vmem>>, vector<16x128xf32>,
    %cst_7 = arith.constant 0.000000e+00 : f32
    %8 = vector.broadcast %cst_7 : f32 to vector<16x128xf32>
    %c0_8 = arith.constant 0 : index
    %c0_9 = arith.constant 0 : index
    %9 = vector.load %arg7[%c0_8, %c0_9] : memref<18x128xf32, #tpu.memory_space<vmem>>, vector<16x128xf32>
    %10 = arith.truncf %9 : vector<16x128xf32> to vector<16x128xbf16>
    %c0_10 = arith.constant 0 : index
    %c0_11 = arith.constant 0 : index
    %c0_12 = arith.constant 0 : index
    %11 = vector.load %arg2[%c0_10, %c0_11, %c0_12] : memref<3x128x128xbf16, #tpu.memory_space<vmem>>, vector<1x128x128xbf16>
    %12 = vector.shape_cast %11 : vector<1x128x128xbf16> to vector<128x128xbf16>
    %cst_13 = arith.constant dense<0.000000e+00> : vector<16x128xf32>
    %13 = tpu.matmul %10, %12, %cst_13 {dimension_numbers = #tpu.dot_dimension_numbers<[1], [0], [0], [1], [0, 0, 1, 1], [], []>} : vector<16x128xbf16>, vector<128x128xbf16>, vector<16x128xf32> -> vector<16x128xf32>
    %14 = arith.addf %8, %13 : vector<16x128xf32>
    %c1_14 = arith.constant 1 : index
    %c0_15 = arith.constant 0 : index
    %15 = vector.load %arg7[%c1_14, %c0_15] : memref<18x128xf32, #tpu.memory_space<vmem>>, vector<16x128xf32>
    %16 = arith.truncf %15 : vector<16x128xf32> to vector<16x128xbf16>
    %c1_16 = arith.constant 1 : index
    %c0_17 = arith.constant 0 : index
    %c0_18 = arith.constant 0 : index
    %17 = vector.load %arg2[%c1_16, %c0_17, %c0_18] : memref<3x128x128xbf16, #tpu.memory_space<vmem>>, vector<1x128x128xbf16>
    %18 = vector.shape_cast %17 : vector<1x128x128xbf16> to vector<128x128xbf16>
    %cst_19 = arith.constant dense<0.000000e+00> : vector<16x128xf32>
    %19 = tpu.matmul %16, %18, %cst_19 {dimension_numbers = #tpu.dot_dimension_numbers<[1], [0], [0], [1], [0, 0, 1, 1], [], []>} : vector<16x128xbf16>, vector<128x128xbf16>, vector<16x128xf32> -> vector<16x128xf32>
    %20 = arith.addf %14, %19 : vector<16x128xf32>
    %c2 = arith.constant 2 : index
    %c0_20 = arith.constant 0 : index
    %21 = vector.load %arg7[%c2, %c0_20] : memref<18x128xf32, #tpu.memory_space<vmem>>, vector<16x128xf32>
    %22 = arith.truncf %21 : vector<16x128xf32> to vector<16x128xbf16>
    %c2_21 = arith.constant 2 : index
    %c0_22 = arith.constant 0 : index
    %c0_23 = arith.constant 0 : index
    %23 = vector.load %arg2[%c2_21, %c0_22, %c0_23] : memref<3x128x128xbf16, #tpu.memory_space<vmem>>, vector<1x128x128xbf16>
    %24 = vector.shape_cast %23 : vector<1x128x128xbf16> to vector<128x128xbf16>
    %cst_24 = arith.constant dense<0.000000e+00> : vector<16x128xf32>
    %25 = tpu.matmul %22, %24, %cst_24 {dimension_numbers = #tpu.dot_dimension_numbers<[1], [0], [0], [1], [0, 0, 1, 1], [], []>} : vector<16x128xbf16>, vector<128x128xbf16>, vector<16x128xf32> -> vector<16x128xf32>
    %26 = arith.addf %20, %25 : vector<16x128xf32>
    %c0_25 = arith.constant 0 : index
    %c0_26 = arith.constant 0 : index
    %27 = vector.load %arg3[%c0_25, %c0_26] : memref<1x128xf32, #tpu.memory_space<vmem>>, vector<1x128xf32>
    %28 = vector.broadcast %27 : vector<1x128xf32> to vector<16x128xf32>
    %29 = arith.addf %26, %28 : vector<16x128xf32>
    %cst_27 = arith.constant 0.000000e+00 : f32
    %30 = vector.broadcast %cst_27 : f32 to vector<16x128xf32>
    %31 = arith.maximumf %29, %30 : vector<16x128xf32>
    %cst_28 = arith.constant 0.000000e+00 : f32
    %32 = vector.broadcast %cst_28 : f32 to vector<1x128xf32>
    %c0_29 = arith.constant 0 : index
    %c0_30 = arith.constant 0 : index
    %33 = vector.load %arg8[%c0_29, %c0_30] : memref<18x128xf32, #tpu.memory_space<vmem>>, vector<1x128xf32>
    tpu.vector_store %arg8[%c0_29, %c0_30], %32 {strides = array<i32>} : memref<18x128xf32, #tpu.memory_space<vmem>>, vector<1x128xf32>,
    %cst_31 = arith.constant 0.000000e+00 : f32
    %34 = vector.broadcast %cst_31 : f32 to vector<1x128xf32>
    %c17_32 = arith.constant 17 : index
    %c0_33 = arith.constant 0 : index
    %35 = vector.load %arg8[%c17_32, %c0_33] : memref<18x128xf32, #tpu.memory_space<vmem>>, vector<1x128xf32>
    tpu.vector_store %arg8[%c17_32, %c0_33], %34 {strides = array<i32>} : memref<18x128xf32, #tpu.memory_space<vmem>>, vector<1x128xf32>,
    %c1_34 = arith.constant 1 : index
    %c0_35 = arith.constant 0 : index
    %36 = vector.load %arg8[%c1_34, %c0_35] : memref<18x128xf32, #tpu.memory_space<vmem>>, vector<16x128xf32>
    tpu.vector_store %arg8[%c1_34, %c0_35], %31 {strides = array<i32>} : memref<18x128xf32, #tpu.memory_space<vmem>>, vector<16x128xf32>,
    %cst_36 = arith.constant 0.000000e+00 : f32
    %37 = vector.broadcast %cst_36 : f32 to vector<16x128xf32>
    %c0_37 = arith.constant 0 : index
    %c0_38 = arith.constant 0 : index
    %38 = vector.load %arg8[%c0_37, %c0_38] : memref<18x128xf32, #tpu.memory_space<vmem>>, vector<16x128xf32>
    %39 = arith.truncf %38 : vector<16x128xf32> to vector<16x128xbf16>
    %c0_39 = arith.constant 0 : index
    %c0_40 = arith.constant 0 : index
    %c0_41 = arith.constant 0 : index
    %40 = vector.load %arg4[%c0_39, %c0_40, %c0_41] : memref<3x128x128xbf16, #tpu.memory_space<vmem>>, vector<1x128x128xbf16>
    %41 = vector.shape_cast %40 : vector<1x128x128xbf16> to vector<128x128xbf16>
    %cst_42 = arith.constant dense<0.000000e+00> : vector<16x128xf32>
    %42 = tpu.matmul %39, %41, %cst_42 {dimension_numbers = #tpu.dot_dimension_numbers<[1], [0], [0], [1], [0, 0, 1, 1], [], []>} : vector<16x128xbf16>, vector<128x128xbf16>, vector<16x128xf32> -> vector<16x128xf32>
    %43 = arith.addf %37, %42 : vector<16x128xf32>
    %c1_43 = arith.constant 1 : index
    %c0_44 = arith.constant 0 : index
    %44 = vector.load %arg8[%c1_43, %c0_44] : memref<18x128xf32, #tpu.memory_space<vmem>>, vector<16x128xf32>
    %45 = arith.truncf %44 : vector<16x128xf32> to vector<16x128xbf16>
    %c1_45 = arith.constant 1 : index
    %c0_46 = arith.constant 0 : index
    %c0_47 = arith.constant 0 : index
    %46 = vector.load %arg4[%c1_45, %c0_46, %c0_47] : memref<3x128x128xbf16, #tpu.memory_space<vmem>>, vector<1x128x128xbf16>
    %47 = vector.shape_cast %46 : vector<1x128x128xbf16> to vector<128x128xbf16>
    %cst_48 = arith.constant dense<0.000000e+00> : vector<16x128xf32>
    %48 = tpu.matmul %45, %47, %cst_48 {dimension_numbers = #tpu.dot_dimension_numbers<[1], [0], [0], [1], [0, 0, 1, 1], [], []>} : vector<16x128xbf16>, vector<128x128xbf16>, vector<16x128xf32> -> vector<16x128xf32>
    %49 = arith.addf %43, %48 : vector<16x128xf32>
    %c2_49 = arith.constant 2 : index
    %c0_50 = arith.constant 0 : index
    %50 = vector.load %arg8[%c2_49, %c0_50] : memref<18x128xf32, #tpu.memory_space<vmem>>, vector<16x128xf32>
    %51 = arith.truncf %50 : vector<16x128xf32> to vector<16x128xbf16>
    %c2_51 = arith.constant 2 : index
    %c0_52 = arith.constant 0 : index
    %c0_53 = arith.constant 0 : index
    %52 = vector.load %arg4[%c2_51, %c0_52, %c0_53] : memref<3x128x128xbf16, #tpu.memory_space<vmem>>, vector<1x128x128xbf16>
    %53 = vector.shape_cast %52 : vector<1x128x128xbf16> to vector<128x128xbf16>
    %cst_54 = arith.constant dense<0.000000e+00> : vector<16x128xf32>
    %54 = tpu.matmul %51, %53, %cst_54 {dimension_numbers = #tpu.dot_dimension_numbers<[1], [0], [0], [1], [0, 0, 1, 1], [], []>} : vector<16x128xbf16>, vector<128x128xbf16>, vector<16x128xf32> -> vector<16x128xf32>
    %55 = arith.addf %49, %54 : vector<16x128xf32>
    %c0_55 = arith.constant 0 : index
    %c0_56 = arith.constant 0 : index
    %c0_57 = arith.constant 0 : index
    %56 = vector.load %arg1[%c0_55, %c0_56, %c0_57] : memref<1x16x128xbf16, #tpu.memory_space<vmem>>, vector<1x16x128xbf16>
    %57 = vector.shape_cast %56 : vector<1x16x128xbf16> to vector<16x128xbf16>
    %58 = arith.extf %57 : vector<16x128xbf16> to vector<16x128xf32>
    %c0_58 = arith.constant 0 : index
    %c0_59 = arith.constant 0 : index
    %59 = vector.load %arg5[%c0_58, %c0_59] : memref<1x128xf32, #tpu.memory_space<vmem>>, vector<1x128xf32>
    %60 = vector.broadcast %59 : vector<1x128xf32> to vector<16x128xf32>
    %61 = arith.addf %55, %60 : vector<16x128xf32>
    %62 = arith.addf %61, %58 : vector<16x128xf32>
    %cst_60 = arith.constant 0.000000e+00 : f32
    %63 = vector.broadcast %cst_60 : f32 to vector<16x128xf32>
    %64 = arith.maximumf %62, %63 : vector<16x128xf32>
    %c0_61 = arith.constant 0 : index
    %c0_62 = arith.constant 0 : index
    %c0_63 = arith.constant 0 : index
    %65 = vector.load %arg6[%c0_61, %c0_62, %c0_63] : memref<1x16x128xf32, #tpu.memory_space<vmem>>, vector<1x16x128xf32>
    %66 = vector.shape_cast %65 : vector<1x16x128xf32> to vector<16x128xf32>
    %67 = vector.shape_cast %64 : vector<16x128xf32> to vector<1x16x128xf32>
    tpu.vector_store %arg6[%c0_61, %c0_62, %c0_63], %67 {strides = array<i32>} : memref<1x16x128xf32, #tpu.memory_space<vmem>>, vector<1x16x128xf32>,
    return
  }
  func.func @transform_0(%arg0: i32) -> (i32, i32, i32) {
    %c0_i32 = arith.constant 0 : i32
    %c0_i32_0 = arith.constant 0 : i32
    %c0_i32_1 = arith.constant 0 : i32
    return %arg0, %c0_i32, %c0_i32_0 : i32, i32, i32
  }
  func.func @transform_1(%arg0: i32) -> (i32, i32, i32) {
    %c0_i32 = arith.constant 0 : i32
    %c0_i32_0 = arith.constant 0 : i32
    %c0_i32_1 = arith.constant 0 : i32
    %c0_i32_2 = arith.constant 0 : i32
    return %c0_i32, %c0_i32_0, %c0_i32_1 : i32, i32, i32
  }
  func.func @transform_2(%arg0: i32) -> (i32, i32) {
    %c0_i32 = arith.constant 0 : i32
    %c0_i32_0 = arith.constant 0 : i32
    %c0_i32_1 = arith.constant 0 : i32
    return %c0_i32, %c0_i32_0 : i32, i32
  }
  func.func @transform_3(%arg0: i32) -> (i32, i32, i32) {
    %c0_i32 = arith.constant 0 : i32
    %c0_i32_0 = arith.constant 0 : i32
    %c0_i32_1 = arith.constant 0 : i32
    %c0_i32_2 = arith.constant 0 : i32
    return %c0_i32, %c0_i32_0, %c0_i32_1 : i32, i32, i32
  }
  func.func @transform_4(%arg0: i32) -> (i32, i32) {
    %c0_i32 = arith.constant 0 : i32
    %c0_i32_0 = arith.constant 0 : i32
    %c0_i32_1 = arith.constant 0 : i32
    return %c0_i32, %c0_i32_0 : i32, i32
  }
  func.func @transform_5(%arg0: i32) -> (i32, i32, i32) {
    %c0_i32 = arith.constant 0 : i32
    %c0_i32_0 = arith.constant 0 : i32
    %c0_i32_1 = arith.constant 0 : i32
    return %arg0, %c0_i32, %c0_i32_0 : i32, i32, i32
  }
}

</mosaic_0001>

<bundles_post_ra>
// kernel: tpu_custom_call.1
= control target key start
LH: loop header
LB: loop body
LE: loop exit
PB: predicated region body
PF: predicated region fallthrough
CT: control target
= control target key end

     0   :  { %10 = vsyncpa [#allocation5], 0  ;;  %s1631_s0 = inlined_call_operand.hbm [shape: bf16[2,16,128], index: 0, kind: input, shape index: {}]   ;;  %s1632_s1 = inlined_call_operand.hbm [shape: bf16[3,128,128], index: 1, kind: input, shape index: {}]   ;;  %s1633_s2 = inlined_call_operand.vmem [shape: f32[1,128], index: 2, kind: input, shape index: {}]   ;;  %s1634_s3 = inlined_call_operand.hbm [shape: bf16[3,128,128], index: 3, kind: input, shape index: {}]   ;;  %s1635_s4 = inlined_call_operand.vmem [shape: f32[1,128], index: 4, kind: input, shape index: {}]   ;;  %s1636_s5 = inlined_call_operand.hbm [shape: f32[2,16,128], index: 5, kind: output, shape index: {}]  }
   0x1   :  { %12 = vsyncpa [#allocation5 + $0x1], 0 }
   0x2   :  { %13 = vsyncpa [#allocation8], 0 }
   0x3   :  { %14 = vsyncpa [#allocation6], 0 }
   0x4   :  { %16 = vsyncpa [#allocation6 + $0x1], 0  ;;  %s1458_s18 = smov 0   ;;  %s1460_s19 = smov 0  }
   0x5   :  { %s1462_s20 = smov 0   ;;  %s1464_s21 = smov 0  }
   0x6 LB: > { %s1479_s22 = sadd.s32 4294967295, %s1419_s21   ;;  %s916_s23 = sadd.s32 4294967294, %s1419_s21   ;;  %s1419_s21 = sphi %s1464_s21, %s1648_s21   ;;  %s1415_s20 = sphi %s1462_s20, %s1647_s20   ;;  %s1411_s19 = sphi %s1460_s19, %s1646_s19   ;;  %s1407_s18 = sphi %s1458_s18, %s1645_s18  }
   0x7   : > { %p42_p0 = scmp.ne.s32.totalorder %s1411_s19, %s1407_s18  ;;  %p43_p1 = scmp.eq.s32.totalorder %s1479_s22, 0 }
   0x8   : > { %p150_p2 = scmp.eq.s32.totalorder %s1479_s22, 1  ;;  %p156_p3 = scmp.eq.s32.totalorder %s916_s23, 1 }
   0x9   : > { %p1488_p4 = por %p43_p1, %p42_p0  ;;  %p917_p5 = scmp.ge.s32.totalorder %s1419_s21, 1 }
   0xa   : > { %p1493_p6 = por %p156_p3, %p42_p0  ;;  %p163_p7 = scmp.lt.s32.totalorder %s1419_s21, 3 }
   0xb   : > { %s174_s28 = sshll.u32 %s1632_s1, 4  ;;  %s1421_s30 = smov [#allocation7]   ;;  %s175_s28 = int_to_ptr.hbm [resolvable:$true] %s174_s28 }
   0xc   : > { %p1501_p8 = pnand %p917_p5, %p163_p7  ;;  %s176_s6 = sshll.u32 %s1421_s30, 4  ;;  %s177_s6 = int_to_ptr.vmem [resolvable:$true] %s176_s6 }
   0xd   : > { %s191_s9 = sshll.u32 %s1634_s3, 4  ;;  %s1637_s10 = smov 64   ;;  %s192_s9 = int_to_ptr.hbm [resolvable:$true] %s191_s9 }
   0xe   : > { %p1196_p9 = pneg %p1501_p8  ;;  %s1423_s11 = smov 4  }
   0xf   : > { %s1424_s12 = smov [#allocation9]   ;;  %s1520_s14 = sadd.s32 1, %s1419_s21  }
  0x10   : > { %p1197_p10 = pnand %p1196_p9, %p43_p1  ;;  %s193_s13 = sshll.u32 %s1424_s12, 4  ;;  %s194_s13 = int_to_ptr.vmem [resolvable:$true] %s193_s13 }
  0x11   : > { %s29_s15 = sadd.s32 1, %s1415_s20  ;;  %s26_s16 = ssub.s32 %s1419_s21, %s1520_s14 }
  0x12   : > { %1199 = dma.hbm_to_vmem [thread:$0]  (!%p1197_p10), %s175_s28, 3072, %s177_s6, [#allocation8], %s1637_s10, %s1637_s10, %s1423_s11  }
  0x13   : > { %1202 = dma.hbm_to_vmem [thread:$0]  (!%p1197_p10), %s192_s9, 3072, %s194_s13, [#allocation8], %s1637_s10, %s1637_s10, %s1423_s11  }
  0x14   : > { %p36_p12 = scmp.ne.s32.totalorder %s1415_s20, %s1411_s19  ;;  %p27_p13 = scmp.eq.s32.totalorder %s26_s16, 0 }
  0x15   : > { %p37_p0 = scmp.eq.s32.totalorder %s1419_s21, 0  ;;  %p1213_p5 = scmp.lt.s32.totalorder %s1419_s21, 2 }
  0x16   : > { %p1530_p3 = por %p150_p2, %p36_p12  ;;  %s210_s26 = sand.u32 1, %s1415_s20  }
  0x17   : > { %s1536_s23 = scalar_select %p27_p13, %s1415_s20, %s29_s15  }
  0x18   : > { %p38_p7 = por %p37_p0, %p36_p12  ;;  %s921_s27 = sshll.u32 %s210_s26, 3 }
  0x19   : > { %s1126_s28 = sshll.u32 %s1419_s21, 3  ;;  %s214_s8 = scalar_lea.vmem [#allocation4], %s921_s27 }
  0x1a   : > { %s219_s7 = scalar_lea.hbm %s1631_s0, %s1126_s28  ;;  %s222_s9 = sshll.u32 %s214_s8, 4  ;;  %s223_s9 = int_to_ptr.vmem [resolvable:$true] %s222_s9 }
  0x1b   : > { %s220_s12 = sshll.u32 %s219_s7, 4  ;;  %p1543_p2 = pnand %p1213_p5, %p38_p7  ;;  %s221_s12 = int_to_ptr.hbm [resolvable:$true] %s220_s12 }
  0x1c   : > { %s211_s15 = scalar_lea.sflag [#allocation5], %s210_s26  ;;  %s1319_s16 = sshra.s32 %s221_s12, 4  ;;  %s1320_s16 = int_to_ptr.hbm [resolvable:$true] %s1319_s16 }
  0x1d   : > { %s1321_s10 = scalar_lea.hbm %s1320_s16, 8  ;;  %p1323_p10 = pneg %p1543_p2 }
  0x1e   : > { %p1322_p9 = scmp.ne.s32.totalorder %s1320_s16, %s1321_s10  ;;  %s1326_s30 = scalar_lea.hbm %s1631_s0, 16 }
  0x1f   : > { %p1327_p0 = scmp.lt.s32.totalorder %s1320_s16, %s1631_s0  ;;  %p1328_p5 = scmp.lt.s32.totalorder %s1326_s30, %s1321_s10 }
  0x20   : > { %p1324_p12 = pnand %p1323_p10, %p1322_p9 }
  0x21   : > { %p1329_p7 = por %p1328_p5, %p1327_p0 }
  0x22   : > { %p1325_p13 = pneg %p1324_p12 }
  0x24   : > { %p1330_p11 = pnand %p1329_p7, %p1325_p13 }
  0x26   : > { %1333 = shalt.err (!%p1330_p11)
}
  0x27   : > { %s1643_s26 = smov 64   ;;  %234 = sbr.rel (%p1501_p8) target bundleno = 385 (0x181), region = 40 }
  0x28   : > { %1206 = dma.hbm_to_vmem [thread:$0]  (!%p1543_p2), %s221_s12, 128, %s223_s9, %s211_s15, %s1643_s26, %s1643_s26, %s1423_s11  }
  0x29   : > { %s1563_s8 = sand.u32 (!%p1501_p8), 1, %s1411_s19  }
  0x2a   : > { %s925_s16 = sshll.u32 (!%p1501_p8), %s1563_s8, 3  ;;  %s237_s10 = scalar_lea.sflag (!%p1501_p8), [#allocation5], %s1563_s8 }
  0x2b   : > { %s1567_s28 = scalar_lea.vmem (!%p1501_p8), [#allocation4], %s925_s16 }
  0x2c   : > { %1394 = dma.done.wait (%p1488_p4), %s237_s10, 128  }
  0x2d   : > { %1396 = vsyncadd (%p1488_p4), %s237_s10, 4294967168 }
  0x2e   : > { %1398 = dma.done.wait (%p43_p1), [#allocation8], 6144  }
  0x2f   : > { %1400 = vsyncadd (%p43_p1), [#allocation8], 4294961152  ;;  %v1425_v0 = vmov 0.0   ;;  %v1142_v1 = vld [vmem:[#allocation7 + $0x78] sm:$0xff]  ;;  %v1141_v4 = vld [vmem:[#allocation7 + $0x70] sm:$0xff]  ;;  %s928_s12 = sshll.u32 %s1563_s8, 4 }
  0x30   : > { %278 = vst [vmem:[#allocation2] sm:$0x1] %v1425_v0  ;;  %v1134_v2 = vld [vmem:[#allocation7 + $0x38] sm:$0xff]  ;;  %373 = vmatpush.bf16.msra.mxu0 %v1142_v1  ;;  %v1133_v5 = vld [vmem:[#allocation7 + $0x30] sm:$0xff]  ;;  %v1140_v7 = vld [vmem:[#allocation7 + $0x68] sm:$0xff]  ;;  %s1175_s13 = sshll.u32 %s1479_s22, 4 }
  0x31   : > { %279 = vst [vmem:[#allocation2 + $0x11] sm:$0x1] %v1425_v0  ;;  %v1150_v3 = vld [vmem:[#allocation7 + $0xb8] sm:$0xff]  ;;  %435 = vmatpush.bf16.msra.mxu1 %v1134_v2  ;;  %v1149_v6 = vld [vmem:[#allocation7 + $0xb0] sm:$0xff]  ;;  %v1132_v8 = vld [vmem:[#allocation7 + $0x28] sm:$0xff]  ;;  %s820_s30 = scalar_lea.hbm %s1636_s5, %s1175_s13  ;;  %s277_s6 = scalar_lea.vmem [#allocation10], %s928_s12 }
  0x32   : > { %541 = vst [vmem:[#allocation3] sm:$0x1] %v1425_v0  ;;  %517 = vmatpush.bf16.msra.mxu2 %v1150_v3  ;;  %v1148_v9 = vld [vmem:[#allocation7 + $0xa8] sm:$0xff]  ;;  %v1578_v10 = vld [vmem:[%s1567_s28] sm:$0xff]   ;;  %v1139_v13 = vld [vmem:[#allocation7 + $0x60] sm:$0xff]  ;;  %s821_s7 = sshll.u32 %s277_s6, 4  ;;  %s822_s7 = int_to_ptr.vmem [resolvable:$true] %s821_s7 }
  0x33   : > { %542 = vst [vmem:[#allocation3 + $0x11] sm:$0x1] %v1425_v0  ;;  %v1178_v11 = vunpack.c.l.bf16 %v1578_v10  ;;  %v1179_v12 = vunpack.c.h.bf16 %v1578_v10  ;;  %v1131_v14 = vld [vmem:[#allocation7 + $0x20] sm:$0xff]  ;;  %v1138_v16 = vld [vmem:[#allocation7 + $0x58] sm:$0xff]  ;;  %v1137_v19 = vld [vmem:[#allocation7 + $0x50] sm:$0xff]  ;;  %s823_s26 = sshll.u32 %s820_s30, 4  ;;  %s824_s26 = int_to_ptr.hbm [resolvable:$true] %s823_s26 }
  0x34   : > { %374 = vmatpush.bf16.msra.mxu0 %v1141_v4  ;;  %v1147_v15 = vld [vmem:[#allocation7 + $0xa0] sm:$0xff]  ;;  %v1130_v17 = vld [vmem:[#allocation7 + $0x18] sm:$0xff]  ;;  %v1129_v20 = vld [vmem:[#allocation7 + $0x10] sm:$0xff]  ;;  %s809_s22 = scalar_lea.sflag [#allocation6], %s1563_s8  ;;  %s1363_s16 = sshra.s32 %s824_s26, 4  ;;  %s1364_s16 = int_to_ptr.hbm [resolvable:$true] %s1363_s16 }
  0x35   : > { %436 = vmatpush.bf16.msra.mxu1 %v1133_v5  ;;  %284 = vst [vmem:[#allocation2 + $0x1] sm:$0xff] %v1178_v11  ;;  %v1146_v18 = vld [vmem:[#allocation7 + $0x98] sm:$0xff]  ;;  %v1145_v21 = vld [vmem:[#allocation7 + $0x90] sm:$0xff]  ;;  %v1136_v22 = vld [vmem:[#allocation7 + $0x48] sm:$0xff]  ;;  %s1365_s10 = scalar_lea.hbm %s1364_s16, 16  ;;  %s1369_s29 = scalar_lea.hbm %s1636_s5, 32 }
  0x36   : > { %518 = vmatpush.bf16.msra.mxu2 %v1149_v6  ;;  %285 = vst [vmem:[#allocation2 + $0x9] sm:$0xff] %v1179_v12  ;;  %v1128_v23 = vld [vmem:[#allocation7 + $0x8] sm:$0xff]  ;;  %v1135_v25 = vld [vmem:[#allocation7 + $0x40] sm:$0xff]  ;;  %v1256_v32 = vld [vmem:[%s1567_s28] sm:$0xff]  ;;  %p1366_p1 = scmp.ne.s32.totalorder %s1364_s16, %s1365_s10  ;;  %p1370_p11 = scmp.lt.s32.totalorder %s1364_s16, %s1636_s5 }
  0x37   : > { %v1144_v24 = vld [vmem:[#allocation7 + $0x88] sm:$0xff]  ;;  %v1127_v26 = vld [vmem:[#allocation7] sm:$0xff]  ;;  %v1166_v35 = vld [vmem:[#allocation9 + $0x78] sm:$0xff]  ;;  %p1371_p2 = scmp.lt.s32.totalorder %s1369_s29, %s1365_s10 }
  0x38   : > { %375 = vmatpush.bf16.msra.mxu0 %v1140_v7  ;;  %v1143_v29 = vld [vmem:[#allocation7 + $0x80] sm:$0xff]  ;;  %632 = vmatpush.bf16.msra.mxu3 %v1166_v35  ;;  %v1165_v36 = vld [vmem:[#allocation9 + $0x70] sm:$0xff]  ;;  %v1158_v37 = vld [vmem:[#allocation9 + $0x38] sm:$0xff]  ;;  %p1367_p4 = pnand %p1366_p1, %p1530_p3 }
  0x39   : > { %437 = vmatpush.bf16.msra.mxu1 %v1132_v8  ;;  %v1174_v38 = vld [vmem:[#allocation9 + $0xb8] sm:$0xff]  ;;  %v1164_v39 = vld [vmem:[#allocation9 + $0x68] sm:$0xff]  ;;  %v1157_v40 = vld [vmem:[#allocation9 + $0x30] sm:$0xff]  ;;  %p1372_p9 = por %p1371_p2, %p1370_p11 }
  0x3a   : > { %519 = vmatpush.bf16.msra.mxu2 %v1148_v9  ;;  %v1173_v41 = vld [vmem:[#allocation9 + $0xb0] sm:$0xff]  ;;  %v1163_v42 = vld [vmem:[#allocation9 + $0x60] sm:$0xff]  ;;  %v1156_v43 = vld [vmem:[#allocation9 + $0x28] sm:$0xff]  ;;  %p1368_p8 = pneg %p1367_p4 }
  0x3b   : > { %v1172_v44 = vld [vmem:[#allocation9 + $0xa8] sm:$0xff]  ;;  %v1162_v45 = vld [vmem:[#allocation9 + $0x58] sm:$0xff]  ;;  %v1155_v46 = vld [vmem:[#allocation9 + $0x20] sm:$0xff] }
  0x3c   : > { %376 = vmatpush.bf16.msra.mxu0 %v1139_v13  ;;  %v286_v27 = vld [vmem:[#allocation2] sm:$0xff]  ;;  %633 = vmatpush.bf16.msra.mxu3 %v1165_v36  ;;  %v1161_v48 = vld [vmem:[#allocation9 + $0x50] sm:$0xff]  ;;  %v1154_v49 = vld [vmem:[#allocation9 + $0x18] sm:$0xff]  ;;  %p1373_p10 = pnand %p1372_p9, %p1368_p8 }
  0x3d   : > { %438 = vmatpush.bf16.msra.mxu1 %v1131_v14  ;;  %v287_v28 = vld [vmem:[#allocation2 + $0x8] sm:$0xff]  ;;  %v1171_v47 = vld [vmem:[#allocation9 + $0xa0] sm:$0xff]  ;;  %v1170_v50 = vld [vmem:[#allocation9 + $0x98] sm:$0xff] }
  0x3e   : > { %520 = vmatpush.bf16.msra.mxu2 %v1147_v15  ;;  %v449_v30 = vld [vmem:[#allocation2 + $0x2] sm:$0xff]  ;;  %v450_v31 = vld [vmem:[#allocation2 + $0xa] sm:$0xff]  ;;  %v288_v33 = vpack.c.bf16 %v287_v28, %v286_v27  ;;  %v1257_v62 = vld [vmem:[%s1633_s2] ss:$0 sm:$0xff] }
  0x3f   : > { %v451_v34 = vpack.c.bf16 %v450_v31, %v449_v30  ;;  %v1160_v51 = vld [vmem:[#allocation9 + $0x48] sm:$0xff]  ;;  %v1153_v52 = vld [vmem:[#allocation9 + $0x10] sm:$0xff]  ;;  %v1159_v54 = vld [vmem:[#allocation9 + $0x40] sm:$0xff] }
  0x40   : > { %377 = vmatpush.bf16.msra.mxu0 %v1138_v16  ;;  %634 = vmatpush.bf16.msra.mxu3 %v1164_v39  ;;  %v1169_v53 = vld [vmem:[#allocation9 + $0x90] sm:$0xff]  ;;  %v1152_v55 = vld [vmem:[#allocation9 + $0x8] sm:$0xff]  ;;  %v1151_v57 = vld [vmem:[#allocation9] sm:$0xff] }
  0x41   : > { %439 = vmatpush.bf16.msra.mxu1 %v1130_v17  ;;  %v1168_v56 = vld [vmem:[#allocation9 + $0x88] sm:$0xff]  ;;  %v1167_v58 = vld [vmem:[#allocation9 + $0x80] sm:$0xff] }
  0x42   : > { %521 = vmatpush.bf16.msra.mxu2 %v1146_v18 }
  0x44   : > { %378 = vmatpush.bf16.msra.mxu0 %v1137_v19  ;;  %635 = vmatpush.bf16.msra.mxu3 %v1163_v42 }
  0x45   : > { %440 = vmatpush.bf16.msra.mxu1 %v1129_v20 }
  0x46   : > { %522 = vmatpush.bf16.msra.mxu2 %v1145_v21 }
  0x48   : > { %379 = vmatpush.bf16.msra.mxu0 %v1136_v22  ;;  %636 = vmatpush.bf16.msra.mxu3 %v1162_v45 }
  0x49   : > { %441 = vmatpush.bf16.msra.mxu1 %v1128_v23 }
  0x4a   : > { %523 = vmatpush.bf16.msra.mxu2 %v1144_v24  ;;  %v1258_v24 = vld [vmem:[%s1635_s4] ss:$0 sm:$0xff] }
  0x4c   : > { %380 = vmatpush.bf16.msra.mxu0 %v1135_v25  ;;  %637 = vmatpush.bf16.msra.mxu3 %v1161_v48 }
  0x4d   : > { %442 = vmatpush.bf16.msra.mxu1 %v1127_v26 }
  0x4e   : > { %524 = vmatpush.bf16.msra.mxu2 %v1143_v29 }
  0x4f   : > { %381 = vmatmul.bf16.vlgmr.msra.gmra.mxu0 %v1256_v32 }
  0x50   : > { %443 = vmatmul.bf16.vlgmr.msra.gmra.mxu1 %v288_v33  ;;  %694 = vmatpush.bf16.msrb.mxu0 %v1158_v37 }
  0x51   : > { %525 = vmatmul.bf16.vlgmr.msra.gmra.mxu2 %v451_v34  ;;  %776 = vmatpush.bf16.msrb.mxu1 %v1174_v38 }
  0x52   : > { %638 = vmatpush.bf16.msra.mxu3 %v1160_v51 }
  0x54   : > { %695 = vmatpush.bf16.msrb.mxu0 %v1157_v40 }
  0x55   : > { %777 = vmatpush.bf16.msrb.mxu1 %v1173_v41 }
  0x56   : > { %639 = vmatpush.bf16.msra.mxu3 %v1159_v54 }
  0x58   : > { %696 = vmatpush.bf16.msrb.mxu0 %v1156_v43 }
  0x59   : > { %778 = vmatpush.bf16.msrb.mxu1 %v1172_v44 }
  0x5c   : > { %697 = vmatpush.bf16.msrb.mxu0 %v1155_v46 }
  0x5d   : > { %779 = vmatpush.bf16.msrb.mxu1 %v1171_v47 }
  0x60   : > { %698 = vmatpush.bf16.msrb.mxu0 %v1154_v49 }
  0x61   : > { %780 = vmatpush.bf16.msrb.mxu1 %v1170_v50 }
  0x64   : > { %699 = vmatpush.bf16.msrb.mxu0 %v1153_v52 }
  0x65   : > { %781 = vmatpush.bf16.msrb.mxu1 %v1169_v53 }
  0x68   : > { %700 = vmatpush.bf16.msrb.mxu0 %v1152_v55 }
  0x69   : > { %782 = vmatpush.bf16.msrb.mxu1 %v1168_v56 }
  0x6c   : > { %701 = vmatpush.bf16.msrb.mxu0 %v1151_v57 }
  0x6d   : > { %783 = vmatpush.bf16.msrb.mxu1 %v1167_v58 }
  0xcc   : > { %v382_v59 = vpop.f32.mrf.mxu0 }
  0xcd   : > { %v444_v60 = vpop.f32.mrf.mxu1 }
  0xce   : > { %v445_v61 = vadd.f32 %v444_v60, %v382_v59 }
  0xd4   : > { %v526_v63 = vpop.f32.mrf.mxu2  ;;  %v384_v2 = vpop.f32.mrf.mxu0 }
  0xd5   : > { %v531_v0 = vadd.f32 %v526_v63, %v445_v61  ;;  %v446_v3 = vpop.f32.mrf.mxu1 }
  0xd6   : > { %v447_v5 = vadd.f32 %v446_v3, %v384_v2 }
  0xd7   : > { %v537_v1 = vadd.f32 %v1257_v62, %v531_v0 }
  0xd9   : > { %v539_v4 = vmax.f32 %v537_v1, 0.0 }
  0xdb   : > { %543 = vst [vmem:[#allocation3 + $0x1] sm:$0xff] %v539_v4 }
  0xdc   : > { %v528_v6 = vpop.f32.mrf.mxu2 }
  0xdd   : > { %v532_v7 = vadd.f32 %v528_v6, %v447_v5 }
  0xdf   : > { %v538_v8 = vadd.f32 %v1257_v62, %v532_v7 }
  0xe1   : > { %v540_v9 = vmax.f32 %v538_v8, 0.0 }
  0xe2   : > { %v545_v14 = vld [vmem:[#allocation3] sm:$0xff] }
  0xe3   : > { %544 = vst [vmem:[#allocation3 + $0x9] sm:$0xff] %v540_v9  ;;  %v566_v13 = vpack.c.bf16 %v540_v9, %v539_v4 }
  0xe5   : > { %640 = vmatmul.bf16.vlgmr.msra.gmra.mxu3 %v566_v13 }
  0xea   : > { %v546_v15 = vld [vmem:[#allocation3 + $0x8] sm:$0xff] }
  0xeb   : > { %v708_v16 = vld [vmem:[#allocation3 + $0x2] sm:$0xff]  ;;  %v709_v17 = vld [vmem:[#allocation3 + $0xa] sm:$0xff]  ;;  %v547_v18 = vpack.c.bf16 %v546_v15, %v545_v14 }
  0xec   : > { %v710_v19 = vpack.c.bf16 %v709_v17, %v708_v16 }
  0xed   : > { %702 = vmatmul.bf16.vlgmr.msrb.gmra.mxu0 %v547_v18 }
  0xee   : > { %784 = vmatmul.bf16.vlgmr.msrb.gmra.mxu1 %v710_v19 }
 0x168   : > { %v641_v20 = vpop.f32.mrf.mxu3 }
 0x16a   : > { %v703_v21 = vpop.f32.mrf.mxu0 }
 0x16b   : > { %v785_v22 = vpop.f32.mrf.mxu1  ;;  %v704_v23 = vadd.f32 %v703_v21, %v641_v20 }
 0x16d   : > { %v790_v25 = vadd.f32 %v785_v22, %v704_v23 }
 0x16f   : > { %v800_v26 = vadd.f32 %v1258_v24, %v790_v25 }
 0x170   : > { %v643_v29 = vpop.f32.mrf.mxu3 }
 0x171   : > { %v802_v27 = vadd.f32 %v1178_v11, %v800_v26 }
 0x172   : > { %v705_v28 = vpop.f32.mrf.mxu0 }
 0x173   : > { %v804_v30 = vmax.f32 %v802_v27, 0.0  ;;  %v706_v31 = vadd.f32 %v705_v28, %v643_v29  ;;  %v787_v32 = vpop.f32.mrf.mxu1 }
 0x175   : > { %806 = vst [vmem:[%s277_s6] sm:$0xff] %v804_v30  ;;  %v791_v33 = vadd.f32 %v787_v32, %v706_v31 }
 0x177   : > { %v801_v34 = vadd.f32 %v1258_v24, %v791_v33 }
 0x179   : > { %v803_v11 = vadd.f32 %v1179_v12, %v801_v34 }
 0x17b   : > { %v805_v35 = vmax.f32 %v803_v11, 0.0 }
 0x17d   : > { %807 = vst [vmem:[%s277_s6 + $0x8] sm:$0xff] %v805_v35 }
 0x17e   : > { %1376 = shalt.err (!%p1373_p10)
}
 0x17f   : > { %s1426_s8 = smov 128   ;;  %s1427_s12 = smov 8  }
 0x180   : > { %1194 = dma.vmem_to_hbm [thread:$0]  (%p1530_p3), %s822_s7, 256, %s824_s26, %s809_s22, %s1426_s8, %s1426_s8, %s1427_s12  }
 0x181 PF: > { %s838_s13 = sand.u32 1, %s1407_s18   ;;  %p1644_p12 = scmp.ge.s32.totalorder %s1419_s21, 2 }
 0x182   : > { %s839_s15 = scalar_lea.sflag [#allocation6], %s838_s13 }
 0x183   : > { %p1208_p13 = pnand %p1644_p12, %p1493_p6 }
 0x185   : > { %p1209_p0 = pneg %p1208_p13 }
 0x187   : > { %1402 = dma.done.wait (%p1209_p0), %s839_s15, 256  }
 0x188   : > { %1404 = vsyncadd (%p1209_p0), %s839_s15, 4294967040  ;;  %p19_p5 = scmp.ge.s32.totalorder %s1520_s14, 4   ;;  %s1645_s18 = smov %s1411_s19 }
 0x189   : > { %s1646_s19 = smov %s1415_s20  ;;  %s1647_s20 = smov %s1536_s23 }
 0x18a   : > { %s1648_s21 = smov %s1520_s14  ;;  %21 = sbr.rel (!%p19_p5) target bundleno = 6 (0x6), region = 97 }
 0x18f   :  { %845 = vsyncpa [#allocation5], 1 }
 0x190   :  { %847 = vsyncpa [#allocation5 + $0x1], 1 }
 0x191   :  { %848 = vsyncpa [#allocation8], 1 }
 0x192   :  { %849 = vsyncpa [#allocation6], 1 }
 0x193   :  { %851 = vsyncpa [#allocation6 + $0x1], 1 }

</bundles_post_ra>
